<compile_context>
chip_gen: v7x
topology: tpu7x:2x2x1
jax: 0.10.0
libtpu: 0.0.40
codegen_flags: <defaults>
</compile_context>

<pallas_src>
import functools

import jax
import jax.numpy as jnp
from jax.experimental import pallas as pl
from jax.experimental.pallas import tpu as pltpu


NUM_CLASSES = 10
LANE = 128
OUT_PAD = 128        # lane-padded width of the final stage inside the kernel
MAX_BATCH_TILE = 128  # keeps the (Bt, 256) f32 layer-1 accumulator spill-free


def _round_up(x, m):
    return ((x + m - 1) // m) * m


# ----------------------------------------------------------------------------
# Kernels
# ----------------------------------------------------------------------------
def _layer(h_bf16, w_ref, b_ref, *, apply_relu):
    # bf16 operands -> MXU single pass; f32 accumulate; bias/ReLU in f32.
    acc = jnp.dot(h_bf16, w_ref[...], preferred_element_type=jnp.float32)
    acc = acc + b_ref[...]
    if apply_relu:
        acc = jnp.maximum(acc, 0.0)
    return acc


def _fused_mlp_kernel(x_ref, w1_ref, b1_ref, w2_ref, b2_ref,
                      w3_ref, b3_ref, w4_ref, b4_ref, o_ref):
    # x: (Bt, 784) f32 (cast fused in-kernel), weights bf16, biases f32,
    # out: (Bt, 128) f32 (lane-padded; cols >= 10 are zero by construction).
    h = x_ref[...].astype(jnp.bfloat16)
    h = _layer(h, w1_ref, b1_ref, apply_relu=True).astype(jnp.bfloat16)
    h = _layer(h, w2_ref, b2_ref, apply_relu=True).astype(jnp.bfloat16)
    h = _layer(h, w3_ref, b3_ref, apply_relu=True).astype(jnp.bfloat16)
    o_ref[...] = _layer(h, w4_ref, b4_ref, apply_relu=False)


def _single_stage_kernel(x_ref, w_ref, b_ref, o_ref, *, apply_relu):
    h = x_ref[...].astype(jnp.bfloat16)
    o_ref[...] = _layer(h, w_ref, b_ref, apply_relu=apply_relu)


_VMEM_SPEC = pl.BlockSpec(memory_space=pltpu.MemorySpace.VMEM)


# ----------------------------------------------------------------------------
# Jitted wrappers
# ----------------------------------------------------------------------------
@jax.jit
def fused_forward(x, w1, b1, w2, b2, w3, b3, w4, b4):
    """Full 4-stage pipeline in one pallas_call.  Returns (B, 10) f32."""
    B, fin = x.shape

    # Batch tile: full batch if small (rounded to a sublane multiple of 8),
    # otherwise 128 rows per tile (full MXU M-fill, spill-free accumulator).
    bt = MAX_BATCH_TILE if B >= MAX_BATCH_TILE else _round_up(B, 8)
    bp = _round_up(B, bt)
    if bp != B:
        x = jnp.pad(x, ((0, bp - B), (0, 0)))
    n_tiles = bp // bt

    def _const_spec(arr):
        # Weights/biases: one full-array block, same block for every grid
        # step -> DMA'd once, VMEM-resident across all batch tiles.
        return pl.BlockSpec(arr.shape, lambda i: (0, 0))

    weights = (w1, b1, w2, b2, w3, b3, w4, b4)
    y = pl.pallas_call(
        _fused_mlp_kernel,
        out_shape=jax.ShapeDtypeStruct((bp, OUT_PAD), jnp.float32),
        grid=(n_tiles,),
        in_specs=[pl.BlockSpec((bt, fin), lambda i: (i, 0))]
                 + [_const_spec(p) for p in weights],
        out_specs=pl.BlockSpec((bt, OUT_PAD), lambda i: (i, 0)),
        compiler_params=pltpu.CompilerParams(
            dimension_semantics=("parallel",)),
    )(x, *weights)
    return y[:B, :NUM_CLASSES]


@functools.partial(jax.jit, static_argnames=("apply_relu", "out_valid"))
def stage_forward(x, w_bf16, b_f32, *, apply_relu, out_valid):
    """One stage (matches PyTorch SimpleNet.forward(x, stage))."""
    B = x.shape[0]
    fout_pad = w_bf16.shape[1]   # already lane-padded to a multiple of 128
    y = pl.pallas_call(
        functools.partial(_single_stage_kernel, apply_relu=apply_relu),
        out_shape=jax.ShapeDtypeStruct((B, fout_pad), jnp.float32),
        in_specs=[_VMEM_SPEC] * 3,
        out_specs=_VMEM_SPEC,
    )(x, w_bf16, b_f32)
    return y[:, :out_valid]


# ----------------------------------------------------------------------------
# Module
# ----------------------------------------------------------------------------
class SimpleNetPallas:
    """JAX/Pallas port of the PyTorch SimpleNet.

    stage1: Linear(784, 256) + ReLU
    stage2: Linear(256, 128) + ReLU
    stage3: Linear(128,  64) + ReLU
    stage4: Linear( 64,  10)         (no ReLU)
    """

    DIMS = [(28 * 28, 256), (256, 128), (128, 64), (64, NUM_CLASSES)]

    def __init__(self, key):
        # f32 "master" params (PyTorch-like U(-1/sqrt(fin), 1/sqrt(fin)) init).
        self.params_f32 = []
        for fin, fout in self.DIMS:
            key, kw, kb = jax.random.split(key, 3)
            bound = 1.0 / (fin ** 0.5)
            w = jax.random.uniform(kw, (fin, fout), jnp.float32, -bound, bound)
            b = jax.random.uniform(kb, (fout,), jnp.float32, -bound, bound)
            self.params_f32.append((w, b))

        # Per-stage kernel params: bf16 weights, f32 (1, Fout) biases.
        # Any output narrower than 128 lanes (stages 3 and 4) is zero-padded
        # to 128 so stores are unmasked; sliced back by out_valid.
        self.stage_params = []
        for (fin, fout), (w, b) in zip(self.DIMS, self.params_f32):
            wk = w.astype(jnp.bfloat16)
            bk = b.reshape(1, -1).astype(jnp.float32)
            pad = _round_up(fout, LANE) - fout
            if pad:
                wk = jnp.pad(wk, ((0, 0), (0, pad)))
                bk = jnp.pad(bk, ((0, 0), (0, pad)))
            self.stage_params.append((wk, bk))

        # Fused-path params: additionally pad the stage-3 -> stage-4 boundary
        # (K dim of w4) to 128 so every intermediate is lane-dense.
        self.fused_params = list(self.stage_params)
        w4, b4 = self.fused_params[-1]
        krow_pad = LANE - w4.shape[0]
        if krow_pad:
            w4 = jnp.pad(w4, ((0, krow_pad), (0, 0)))
        self.fused_params[-1] = (w4, b4)

    # Exactly one stage, like the PyTorch module's forward(x, stage).
    def forward(self, x, stage: int):
        w, b = self.stage_params[stage - 1]
        return stage_forward(
            x, w, b,
            apply_relu=(stage != 4),
            out_valid=self.DIMS[stage - 1][1],
        )

    # Optimized fused path: all 4 stages in one pallas_call.
    def forward_pipeline(self, x):
        flat = [p for pair in self.fused_params for p in pair]
        return fused_forward(x, *flat)


# ----------------------------------------------------------------------------
# Self-test
# ----------------------------------------------------------------------------
if __name__ == "__main__":
    key = jax.random.PRNGKey(0)
    key, kx = jax.random.split(key)

    net = SimpleNetPallas(key)

    batch = 8
    x = jax.random.normal(kx, (batch, 28 * 28), jnp.float32)

    # Fused single-kernel pipeline (the optimized path).
    out_fused = jax.block_until_ready(net.forward_pipeline(x))
    assert out_fused.shape == (batch, NUM_CLASSES), out_fused.shape
    assert out_fused.dtype == jnp.float32

    # Per-stage path (matches PyTorch forward(x, stage) semantics).
    h = x
    for stage in (1, 2, 3, 4):
        h = net.forward(h, stage)
    out_staged = jax.block_until_ready(h)
    assert out_staged.shape == (batch, NUM_CLASSES)

    # Plain-JAX reference with the same bf16-operand / f32-accumulate math.
    ref = x
    for i, (w, b) in enumerate(net.params_f32):
        acc = jnp.dot(ref.astype(jnp.bfloat16), w.astype(jnp.bfloat16),
                      preferred_element_type=jnp.float32) + b
        if i != 3:
            acc = jnp.maximum(acc, 0.0)
        ref = acc

    assert jnp.allclose(out_fused, out_staged, atol=1e-4, rtol=1e-4), (
        jnp.max(jnp.abs(out_fused - out_staged)))
    # bf16 operands => looser tolerance vs reference.
    assert jnp.allclose(out_fused, ref, atol=1e-2, rtol=1e-2), (
        jnp.max(jnp.abs(out_fused - ref)))

    print("KERNEL_OK")
</pallas_src>

<mosaic_0001>
module attributes {stable_mosaic.version = 11 : i64} {
  func.func @_fused_mlp_kernel(%arg0: i32, %arg1: memref<8x784xf32, #tpu.memory_space<vmem>>, %arg2: memref<784x256xbf16, #tpu.memory_space<vmem>>, %arg3: memref<1x256xf32, #tpu.memory_space<vmem>>, %arg4: memref<256x128xbf16, #tpu.memory_space<vmem>>, %arg5: memref<1x128xf32, #tpu.memory_space<vmem>>, %arg6: memref<128x128xbf16, #tpu.memory_space<vmem>>, %arg7: memref<1x128xf32, #tpu.memory_space<vmem>>, %arg8: memref<128x128xbf16, #tpu.memory_space<vmem>>, %arg9: memref<1x128xf32, #tpu.memory_space<vmem>>, %arg10: memref<8x128xf32, #tpu.memory_space<vmem>>) attributes {dimension_semantics = [#tpu.dimension_semantics<parallel>], iteration_bounds = array<i64: 1>, scalar_prefetch = 0 : i64, scratch_operands = 0 : i64, tpu.core_type = #tpu.core_type<tc>, window_params = [{transform_indices = @transform_0, window_bounds = array<i64: 8, 784>}, {pipeline_mode = #tpu.pipeline_mode<synchronous>, transform_indices = @transform_1, window_bounds = array<i64: 784, 256>}, {pipeline_mode = #tpu.pipeline_mode<synchronous>, transform_indices = @transform_2, window_bounds = array<i64: 1, 256>}, {pipeline_mode = #tpu.pipeline_mode<synchronous>, transform_indices = @transform_3, window_bounds = array<i64: 256, 128>}, {pipeline_mode = #tpu.pipeline_mode<synchronous>, transform_indices = @transform_4, window_bounds = array<i64: 1, 128>}, {pipeline_mode = #tpu.pipeline_mode<synchronous>, transform_indices = @transform_5, window_bounds = array<i64: 128, 128>}, {pipeline_mode = #tpu.pipeline_mode<synchronous>, transform_indices = @transform_6, window_bounds = array<i64: 1, 128>}, {pipeline_mode = #tpu.pipeline_mode<synchronous>, transform_indices = @transform_7, window_bounds = array<i64: 128, 128>}, {pipeline_mode = #tpu.pipeline_mode<synchronous>, transform_indices = @transform_8, window_bounds = array<i64: 1, 128>}, {transform_indices = @transform_9, window_bounds = array<i64: 8, 128>}]} {
    %c0 = arith.constant 0 : index
    %c0_0 = arith.constant 0 : index
    %0 = vector.load %arg1[%c0, %c0_0] : memref<8x784xf32, #tpu.memory_space<vmem>>, vector<8x784xf32>
    %1 = arith.truncf %0 : vector<8x784xf32> to vector<8x784xbf16>
    %c0_1 = arith.constant 0 : index
    %c0_2 = arith.constant 0 : index
    %2 = vector.load %arg2[%c0_1, %c0_2] : memref<784x256xbf16, #tpu.memory_space<vmem>>, vector<784x256xbf16>
    %cst = arith.constant dense<0.000000e+00> : vector<8x256xf32>
    %3 = tpu.matmul %1, %2, %cst {dimension_numbers = #tpu.dot_dimension_numbers<[1], [0], [0], [1], [0, 0, 1, 1], [], []>} : vector<8x784xbf16>, vector<784x256xbf16>, vector<8x256xf32> -> vector<8x256xf32>
    %c0_3 = arith.constant 0 : index
    %c0_4 = arith.constant 0 : index
    %4 = vector.load %arg3[%c0_3, %c0_4] : memref<1x256xf32, #tpu.memory_space<vmem>>, vector<1x256xf32>
    %5 = vector.broadcast %4 : vector<1x256xf32> to vector<8x256xf32>
    %6 = arith.addf %3, %5 : vector<8x256xf32>
    %cst_5 = arith.constant 0.000000e+00 : f32
    %7 = vector.broadcast %cst_5 : f32 to vector<8x256xf32>
    %8 = arith.maximumf %6, %7 : vector<8x256xf32>
    %9 = arith.truncf %8 : vector<8x256xf32> to vector<8x256xbf16>
    %c0_6 = arith.constant 0 : index
    %c0_7 = arith.constant 0 : index
    %10 = vector.load %arg4[%c0_6, %c0_7] : memref<256x128xbf16, #tpu.memory_space<vmem>>, vector<256x128xbf16>
    %cst_8 = arith.constant dense<0.000000e+00> : vector<8x128xf32>
    %11 = tpu.matmul %9, %10, %cst_8 {dimension_numbers = #tpu.dot_dimension_numbers<[1], [0], [0], [1], [0, 0, 1, 1], [], []>} : vector<8x256xbf16>, vector<256x128xbf16>, vector<8x128xf32> -> vector<8x128xf32>
    %c0_9 = arith.constant 0 : index
    %c0_10 = arith.constant 0 : index
    %12 = vector.load %arg5[%c0_9, %c0_10] : memref<1x128xf32, #tpu.memory_space<vmem>>, vector<1x128xf32>
    %13 = vector.broadcast %12 : vector<1x128xf32> to vector<8x128xf32>
    %14 = arith.addf %11, %13 : vector<8x128xf32>
    %cst_11 = arith.constant 0.000000e+00 : f32
    %15 = vector.broadcast %cst_11 : f32 to vector<8x128xf32>
    %16 = arith.maximumf %14, %15 : vector<8x128xf32>
    %17 = arith.truncf %16 : vector<8x128xf32> to vector<8x128xbf16>
    %c0_12 = arith.constant 0 : index
    %c0_13 = arith.constant 0 : index
    %18 = vector.load %arg6[%c0_12, %c0_13] : memref<128x128xbf16, #tpu.memory_space<vmem>>, vector<128x128xbf16>
    %cst_14 = arith.constant dense<0.000000e+00> : vector<8x128xf32>
    %19 = tpu.matmul %17, %18, %cst_14 {dimension_numbers = #tpu.dot_dimension_numbers<[1], [0], [0], [1], [0, 0, 1, 1], [], []>} : vector<8x128xbf16>, vector<128x128xbf16>, vector<8x128xf32> -> vector<8x128xf32>
    %c0_15 = arith.constant 0 : index
    %c0_16 = arith.constant 0 : index
    %20 = vector.load %arg7[%c0_15, %c0_16] : memref<1x128xf32, #tpu.memory_space<vmem>>, vector<1x128xf32>
    %21 = vector.broadcast %20 : vector<1x128xf32> to vector<8x128xf32>
    %22 = arith.addf %19, %21 : vector<8x128xf32>
    %cst_17 = arith.constant 0.000000e+00 : f32
    %23 = vector.broadcast %cst_17 : f32 to vector<8x128xf32>
    %24 = arith.maximumf %22, %23 : vector<8x128xf32>
    %25 = arith.truncf %24 : vector<8x128xf32> to vector<8x128xbf16>
    %c0_18 = arith.constant 0 : index
    %c0_19 = arith.constant 0 : index
    %26 = vector.load %arg8[%c0_18, %c0_19] : memref<128x128xbf16, #tpu.memory_space<vmem>>, vector<128x128xbf16>
    %cst_20 = arith.constant dense<0.000000e+00> : vector<8x128xf32>
    %27 = tpu.matmul %25, %26, %cst_20 {dimension_numbers = #tpu.dot_dimension_numbers<[1], [0], [0], [1], [0, 0, 1, 1], [], []>} : vector<8x128xbf16>, vector<128x128xbf16>, vector<8x128xf32> -> vector<8x128xf32>
    %c0_21 = arith.constant 0 : index
    %c0_22 = arith.constant 0 : index
    %28 = vector.load %arg9[%c0_21, %c0_22] : memref<1x128xf32, #tpu.memory_space<vmem>>, vector<1x128xf32>
    %29 = vector.broadcast %28 : vector<1x128xf32> to vector<8x128xf32>
    %30 = arith.addf %27, %29 : vector<8x128xf32>
    %c0_23 = arith.constant 0 : index
    %c0_24 = arith.constant 0 : index
    %31 = vector.load %arg10[%c0_23, %c0_24] : memref<8x128xf32, #tpu.memory_space<vmem>>, vector<8x128xf32>
    tpu.vector_store %arg10[%c0_23, %c0_24], %30 {strides = array<i32>} : memref<8x128xf32, #tpu.memory_space<vmem>>, vector<8x128xf32>,
    return
  }
  func.func @transform_0(%arg0: i32) -> (i32, i32) {
    %c0_i32 = arith.constant 0 : i32
    %c0_i32_0 = arith.constant 0 : i32
    return %arg0, %c0_i32 : i32, i32
  }
  func.func @transform_1(%arg0: i32) -> (i32, i32) {
    %c0_i32 = arith.constant 0 : i32
    %c0_i32_0 = arith.constant 0 : i32
    %c0_i32_1 = arith.constant 0 : i32
    return %c0_i32, %c0_i32_0 : i32, i32
  }
  func.func @transform_2(%arg0: i32) -> (i32, i32) {
    %c0_i32 = arith.constant 0 : i32
    %c0_i32_0 = arith.constant 0 : i32
    %c0_i32_1 = arith.constant 0 : i32
    return %c0_i32, %c0_i32_0 : i32, i32
  }
  func.func @transform_3(%arg0: i32) -> (i32, i32) {
    %c0_i32 = arith.constant 0 : i32
    %c0_i32_0 = arith.constant 0 : i32
    %c0_i32_1 = arith.constant 0 : i32
    return %c0_i32, %c0_i32_0 : i32, i32
  }
  func.func @transform_4(%arg0: i32) -> (i32, i32) {
    %c0_i32 = arith.constant 0 : i32
    %c0_i32_0 = arith.constant 0 : i32
    %c0_i32_1 = arith.constant 0 : i32
    return %c0_i32, %c0_i32_0 : i32, i32
  }
  func.func @transform_5(%arg0: i32) -> (i32, i32) {
    %c0_i32 = arith.constant 0 : i32
    %c0_i32_0 = arith.constant 0 : i32
    %c0_i32_1 = arith.constant 0 : i32
    return %c0_i32, %c0_i32_0 : i32, i32
  }
  func.func @transform_6(%arg0: i32) -> (i32, i32) {
    %c0_i32 = arith.constant 0 : i32
    %c0_i32_0 = arith.constant 0 : i32
    %c0_i32_1 = arith.constant 0 : i32
    return %c0_i32, %c0_i32_0 : i32, i32
  }
  func.func @transform_7(%arg0: i32) -> (i32, i32) {
    %c0_i32 = arith.constant 0 : i32
    %c0_i32_0 = arith.constant 0 : i32
    %c0_i32_1 = arith.constant 0 : i32
    return %c0_i32, %c0_i32_0 : i32, i32
  }
  func.func @transform_8(%arg0: i32) -> (i32, i32) {
    %c0_i32 = arith.constant 0 : i32
    %c0_i32_0 = arith.constant 0 : i32
    %c0_i32_1 = arith.constant 0 : i32
    return %c0_i32, %c0_i32_0 : i32, i32
  }
  func.func @transform_9(%arg0: i32) -> (i32, i32) {
    %c0_i32 = arith.constant 0 : i32
    %c0_i32_0 = arith.constant 0 : i32
    return %arg0, %c0_i32 : i32, i32
  }
}

</mosaic_0001>

<bundles_post_ra>
// kernel: fused_forward.1
= control target key start
LH: loop header
LB: loop body
LE: loop exit
PB: predicated region body
PF: predicated region fallthrough
CT: control target
= control target key end

     0   :  { %14 = vsyncpa [#allocation3], 0  ;;  %s2037_s0 = inlined_call_operand.hbm [shape: f32[8,784], index: 0, kind: input, shape index: {}]   ;;  %s2038_s1 = inlined_call_operand.hbm [shape: bf16[784,256], index: 1, kind: input, shape index: {}]   ;;  %s2039_s2 = inlined_call_operand.vmem [shape: f32[1,256], index: 2, kind: input, shape index: {}]   ;;  %s2040_s3 = inlined_call_operand.hbm [shape: bf16[256,128], index: 3, kind: input, shape index: {}]   ;;  %s2041_s4 = inlined_call_operand.vmem [shape: f32[1,128], index: 4, kind: input, shape index: {}]   ;;  %s2042_s5 = inlined_call_operand.hbm [shape: bf16[128,128], index: 5, kind: input, shape index: {}]   ;;  %s2043_s6 = inlined_call_operand.vmem [shape: f32[1,128], index: 6, kind: input, shape index: {}]   ;;  %s2044_s7 = inlined_call_operand.hbm [shape: bf16[128,128], index: 7, kind: input, shape index: {}]   ;;  %s2045_s8 = inlined_call_operand.vmem [shape: f32[1,128], index: 8, kind: input, shape index: {}]   ;;  %s2046_s9 = inlined_call_operand.hbm [shape: f32[8,128], index: 9, kind: output, shape index: {}]  }
   0x1   :  { %15 = vsyncpa [#allocation6], 0 }
   0x2   :  { %16 = vsyncpa [#allocation9], 0 }
   0x3   :  { %17 = vsyncpa [#allocation4], 0  ;;  %s1863_s30 = smov [#allocation5]   ;;  %s1723_s13 = scalar_lea.hbm %s2038_s1, 12544 }
   0x4   :  { %s33_s10 = sshll.u32 %s1863_s30, 4  ;;  %p1724_p0 = scmp.ne.s32.totalorder %s2038_s1, %s1723_s13  ;;  %s34_s10 = int_to_ptr.vmem [resolvable:$true] %s33_s10 }
   0x5   :  { %p1727_p1 = scmp.lt.u32.totalorder %s1723_s13, %s2038_s1 }
   0x7   :  { %p1729_p2 = pnand %p1727_p1, %p1724_p0 }
   0x9   :  { %1732 = shalt.err (!%p1729_p2)
}
   0xa   :  { %s1733_s18 = scalar_lea.vmem %s34_s10, 12544  ;;  %p1738_p4 = scmp.lt.s32.totalorder %s34_s10, %s34_s10 }
   0xb   :  { %p1734_p3 = scmp.ne.s32.totalorder %s34_s10, %s1733_s18  ;;  %p1739_p5 = scmp.lt.s32.totalorder %s1733_s18, %s1733_s18 }
   0xd   :  { %p1740_p6 = por %p1739_p5, %p1738_p4 }
   0xf   :  { %p1741_p7 = pnand %p1740_p6, %p1734_p3 }
  0x11   :  { %1744 = shalt.err (!%p1741_p7)
}
  0x12   :  { %s1864_s19 = smov 128   ;;  %s1865_s20 = smov 8  }
  0x13   :  { %39 = dma.hbm_to_vmem [thread:$0]  %s2038_s1, 12544, %s34_s10, [#allocation6], %s1864_s19, %s1864_s19, %s1865_s20  }
  0x14   :  { %s1866_s23 = smov [#allocation8]   ;;  %s1867_s25 = smov [#allocation2]  }
  0x15   :  { %s61_s24 = sshll.u32 %s1866_s23, 4  ;;  %s24_s26 = sshll.u32 %s1867_s25, 4  ;;  %s62_s24 = int_to_ptr.vmem [resolvable:$true] %s61_s24  ;;  %s25_s26 = int_to_ptr.vmem [resolvable:$true] %s24_s26 }
  0x16   :  { %s1745_s29 = scalar_lea.hbm %s2042_s5, 1024 }
  0x17   :  { %p1746_p8 = scmp.ne.s32.totalorder %s2042_s5, %s1745_s29  ;;  %p1749_p9 = scmp.lt.u32.totalorder %s1745_s29, %s2042_s5 }
  0x19   :  { %p1751_p10 = pnand %p1749_p9, %p1746_p8 }
  0x1b   :  { %1754 = shalt.err (!%p1751_p10)
}
  0x1c   :  { %s1755_s1 = scalar_lea.vmem %s62_s24, 1024  ;;  %p1760_p12 = scmp.lt.s32.totalorder %s62_s24, %s62_s24 }
  0x1d   :  { %p1756_p11 = scmp.ne.s32.totalorder %s62_s24, %s1755_s1  ;;  %p1761_p13 = scmp.lt.s32.totalorder %s1755_s1, %s1755_s1 }
  0x1f   :  { %p1762_p0 = por %p1761_p13, %p1760_p12 }
  0x21   :  { %p1763_p1 = pnand %p1762_p0, %p1756_p11 }
  0x23   :  { %1766 = shalt.err (!%p1763_p1)
}
  0x24   :  { %s1868_s10 = smov 64   ;;  %s1869_s14 = smov 4  }
  0x25   :  { %67 = dma.hbm_to_vmem [thread:$0]  %s2042_s5, 1024, %s62_s24, [#allocation9], %s1868_s10, %s1868_s10, %s1869_s14  }
  0x26   :  { %s1767_s19 = scalar_lea.hbm %s2037_s0, 896 }
  0x27   :  { %p1768_p2 = scmp.ne.s32.totalorder %s2037_s0, %s1767_s19  ;;  %p1771_p3 = scmp.lt.u32.totalorder %s1767_s19, %s2037_s0 }
  0x29   :  { %p1773_p4 = pnand %p1771_p3, %p1768_p2 }
  0x2b   :  { %1776 = shalt.err (!%p1773_p4)
}
  0x2c   :  { %s1777_s25 = scalar_lea.vmem %s25_s26, 896  ;;  %p1782_p6 = scmp.lt.s32.totalorder %s25_s26, %s25_s26 }
  0x2d   :  { %p1778_p5 = scmp.ne.s32.totalorder %s25_s26, %s1777_s25  ;;  %p1783_p7 = scmp.lt.s32.totalorder %s1777_s25, %s1777_s25 }
  0x2f   :  { %p1784_p8 = por %p1783_p7, %p1782_p6 }
  0x31   :  { %p1785_p9 = pnand %p1784_p8, %p1778_p5 }
  0x33   :  { %1788 = shalt.err (!%p1785_p9)
}
  0x34   :  { %27 = dma.hbm_to_vmem [thread:$0]  %s2037_s0, 896, %s25_s26, [#allocation3]  }
  0x35   :  { %s1870_s27 = smov [#allocation7]   ;;  %s1871_s29 = smov [#allocation10]  }
  0x36   :  { %s47_s28 = sshll.u32 %s1870_s27, 4  ;;  %s75_s30 = sshll.u32 %s1871_s29, 4  ;;  %s48_s28 = int_to_ptr.vmem [resolvable:$true] %s47_s28  ;;  %s76_s30 = int_to_ptr.vmem [resolvable:$true] %s75_s30 }
  0x37   :  { %s1789_s13 = scalar_lea.hbm %s2040_s3, 2048 }
  0x38   :  { %p1790_p10 = scmp.ne.s32.totalorder %s2040_s3, %s1789_s13  ;;  %p1793_p11 = scmp.lt.u32.totalorder %s1789_s13, %s2040_s3 }
  0x3a   :  { %p1795_p12 = pnand %p1793_p11, %p1790_p10 }
  0x3c   :  { %1798 = shalt.err (!%p1795_p12)
}
  0x3d   :  { %s1799_s0 = scalar_lea.vmem %s48_s28, 2048  ;;  %p1804_p0 = scmp.lt.s32.totalorder %s48_s28, %s48_s28 }
  0x3e   :  { %p1800_p13 = scmp.ne.s32.totalorder %s48_s28, %s1799_s0  ;;  %p1805_p1 = scmp.lt.s32.totalorder %s1799_s0, %s1799_s0 }
  0x40   :  { %p1806_p2 = por %p1805_p1, %p1804_p0 }
  0x42   :  { %p1807_p3 = pnand %p1806_p2, %p1800_p13 }
  0x44   :  { %1810 = shalt.err (!%p1807_p3)
}
  0x45   :  { %53 = dma.hbm_to_vmem [thread:$0]  %s2040_s3, 2048, %s48_s28, [#allocation6], %s1868_s10, %s1868_s10, %s1869_s14  }
  0x46   :  { %s1811_s21 = scalar_lea.hbm %s2044_s7, 1024 }
  0x47   :  { %p1812_p4 = scmp.ne.s32.totalorder %s2044_s7, %s1811_s21  ;;  %p1815_p5 = scmp.lt.u32.totalorder %s1811_s21, %s2044_s7 }
  0x49   :  { %p1817_p6 = pnand %p1815_p5, %p1812_p4 }
  0x4b   :  { %1820 = shalt.err (!%p1817_p6)
}
  0x4c   :  { %s1821_s24 = scalar_lea.vmem %s76_s30, 1024  ;;  %p1826_p8 = scmp.lt.s32.totalorder %s76_s30, %s76_s30 }
  0x4d   :  { %p1822_p7 = scmp.ne.s32.totalorder %s76_s30, %s1821_s24  ;;  %p1827_p9 = scmp.lt.s32.totalorder %s1821_s24, %s1821_s24 }
  0x4f   :  { %p1828_p10 = por %p1827_p9, %p1826_p8 }
  0x51   :  { %p1829_p11 = pnand %p1828_p10, %p1822_p7 }
  0x53   :  { %1832 = shalt.err (!%p1829_p11)
}
  0x54   :  { %81 = dma.hbm_to_vmem [thread:$0]  %s2044_s7, 1024, %s76_s30, [#allocation9], %s1868_s10, %s1868_s10, %s1869_s14  }
  0x55   :  { %1855 = dma.done.wait [#allocation3], 896  }
  0x56   :  { %1856 = vsyncadd [#allocation3], 4294966400 }
  0x57   :  { %1857 = dma.done.wait [#allocation6], 14592  }
  0x58   :  { %1858 = vsyncadd [#allocation6], 4294952704 }
  0x59   :  { %1859 = dma.done.wait [#allocation9], 2048  }
  0x5a   :  { %1860 = vsyncadd [#allocation9], 4294965248  ;;  %v1544_v0 = vld [vmem:[#allocation5 + $0x104] ss:$8 sps:$4 sm:$0xff]   ;;  %v1546_v1 = vld [vmem:[#allocation5 + $0x100] ss:$8 sps:$4 sm:$0xff]  }
  0x5b   :  { %759 = vmatprep.subr.bf16.mxu0 %v1544_v0  ;;  %v1547_v2 = vld [vmem:[#allocation5 + $0x114] ss:$8 sps:$4 sm:$0xff]   ;;  %v1549_v3 = vld [vmem:[#allocation5 + $0x110] ss:$8 sps:$4 sm:$0xff]   ;;  %v1550_v4 = vld [vmem:[#allocation5 + $0x124] ss:$8 sps:$4 sm:$0xff]  }
  0x5c   :  { %760 = vmatpush1.bf16.msra.mxu0 %v1546_v1  ;;  %v1552_v5 = vld [vmem:[#allocation5 + $0x120] ss:$8 sps:$4 sm:$0xff]   ;;  %v1553_v6 = vld [vmem:[#allocation5 + $0x134] ss:$8 sps:$4 sm:$0xff]   ;;  %v1555_v7 = vld [vmem:[#allocation5 + $0x130] ss:$8 sps:$4 sm:$0xff]  }
  0x5d   :  { %761 = vmatprep.subr.bf16.mxu0 %v1547_v2  ;;  %v1556_v8 = vld [vmem:[#allocation5 + $0x144] ss:$8 sps:$4 sm:$0xff]   ;;  %v1558_v9 = vld [vmem:[#allocation5 + $0x140] ss:$8 sps:$4 sm:$0xff]   ;;  %v1559_v10 = vld [vmem:[#allocation5 + $0x154] ss:$8 sps:$4 sm:$0xff]  }
  0x5e   :  { %v1561_v11 = vld [vmem:[#allocation5 + $0x150] ss:$8 sps:$4 sm:$0xff]   ;;  %v1562_v12 = vld [vmem:[#allocation5 + $0x164] ss:$8 sps:$4 sm:$0xff]   ;;  %v1564_v15 = vld [vmem:[#allocation5 + $0x160] ss:$8 sps:$4 sm:$0xff]  }
  0x5f   :  { %v103_v13 = vld [vmem:[#allocation2 + $0x18] sm:$0xff]  ;;  %v1565_v16 = vld [vmem:[#allocation5 + $0x174] ss:$8 sps:$4 sm:$0xff]   ;;  %v1567_v18 = vld [vmem:[#allocation5 + $0x170] ss:$8 sps:$4 sm:$0xff]   ;;  %vm714_vm0 = vcmask 130048  }
  0x60   :  { %762 = vmatpush1.bf16.msra.mxu0 %v1549_v3  ;;  %v110_v14 = vpack.c.bf16 %v103_v13, %v103_v13  ;;  %v1598_v17 = vld [vmem:[#allocation5 + $0x4] ss:$8 sps:$4 sm:$0xff]   ;;  %v1603_v20 = vld [vmem:[#allocation5] ss:$8 sps:$4 sm:$0xff]   ;;  %v1604_v21 = vld [vmem:[#allocation5 + $0x14] ss:$8 sps:$4 sm:$0xff]  }
  0x61   :  { %763 = vmatprep.subr.bf16.mxu0 %v1550_v4  ;;  %v1568_v19 = vld [vmem:[#allocation5 + $0x184] ss:$8 sps:$4 sm:$0xff]   ;;  %718 = vmatprep.subr.bf16.mxu1 %v1598_v17  ;;  %v1609_v22 = vld [vmem:[#allocation5 + $0x10] ss:$8 sps:$4 sm:$0xff]   ;;  %v1570_v24 = vld [vmem:[#allocation5 + $0x180] ss:$8 sps:$4 sm:$0xff]  }
  0x62   :  { %791 = vmatprep.mubr.bf16.mxu0 %v110_v14  ;;  %719 = vmatpush1.bf16.msra.mxu1 %v1603_v20  ;;  %v1610_v23 = vld [vmem:[#allocation5 + $0x24] ss:$8 sps:$4 sm:$0xff]   ;;  %v1571_v25 = vld [vmem:[#allocation5 + $0x194] ss:$8 sps:$4 sm:$0xff]   ;;  %v1615_v26 = vld [vmem:[#allocation5 + $0x20] ss:$8 sps:$4 sm:$0xff]  }
  0x63   :  { %720 = vmatprep.subr.bf16.mxu1 %v1604_v21  ;;  %v1616_v27 = vld [vmem:[#allocation5 + $0x34] ss:$8 sps:$4 sm:$0xff]   ;;  %v1573_v28 = vld [vmem:[#allocation5 + $0x190] ss:$8 sps:$4 sm:$0xff]   ;;  %v1574_v29 = vld [vmem:[#allocation5 + $0x1a4] ss:$8 sps:$4 sm:$0xff]  }
  0x64   :  { %764 = vmatpush1.bf16.msra.mxu0 %v1552_v5  ;;  %v1621_v30 = vld [vmem:[#allocation5 + $0x30] ss:$8 sps:$4 sm:$0xff]   ;;  %v1622_v31 = vld [vmem:[#allocation5 + $0x44] ss:$8 sps:$4 sm:$0xff]   ;;  %v1576_v32 = vld [vmem:[#allocation5 + $0x1a0] ss:$8 sps:$4 sm:$0xff]  }
  0x65   :  { %765 = vmatprep.subr.bf16.mxu0 %v1553_v6  ;;  %v1577_v33 = vld [vmem:[#allocation5 + $0x1b4] ss:$8 sps:$4 sm:$0xff]   ;;  %v1627_v34 = vld [vmem:[#allocation5 + $0x40] ss:$8 sps:$4 sm:$0xff]   ;;  %v1579_v36 = vld [vmem:[#allocation5 + $0x1b0] ss:$8 sps:$4 sm:$0xff]  }
  0x66   :  { %721 = vmatpush1.bf16.msra.mxu1 %v1609_v22  ;;  %v1628_v35 = vld [vmem:[#allocation5 + $0x54] ss:$8 sps:$4 sm:$0xff]   ;;  %v1580_v37 = vld [vmem:[#allocation5 + $0x1c4] ss:$8 sps:$4 sm:$0xff]   ;;  %v1633_v38 = vld [vmem:[#allocation5 + $0x50] ss:$8 sps:$4 sm:$0xff]  }
  0x67   :  { %722 = vmatprep.subr.bf16.mxu1 %v1610_v23  ;;  %v1634_v39 = vld [vmem:[#allocation5 + $0x64] ss:$8 sps:$4 sm:$0xff]   ;;  %v1582_v40 = vld [vmem:[#allocation5 + $0x1c0] ss:$8 sps:$4 sm:$0xff]   ;;  %v1583_v41 = vld [vmem:[#allocation5 + $0x1d4] ss:$8 sps:$4 sm:$0xff]  }
  0x68   :  { %766 = vmatpush1.bf16.msra.mxu0 %v1555_v7  ;;  %v1639_v42 = vld [vmem:[#allocation5 + $0x60] ss:$8 sps:$4 sm:$0xff]   ;;  %v1640_v43 = vld [vmem:[#allocation5 + $0x74] ss:$8 sps:$4 sm:$0xff]   ;;  %v1585_v44 = vld [vmem:[#allocation5 + $0x1d0] ss:$8 sps:$4 sm:$0xff]  }
  0x69   :  { %767 = vmatprep.subr.bf16.mxu0 %v1556_v8  ;;  %v1586_v45 = vld [vmem:[#allocation5 + $0x1e4] ss:$8 sps:$4 sm:$0xff]   ;;  %v1645_v46 = vld [vmem:[#allocation5 + $0x70] ss:$8 sps:$4 sm:$0xff]   ;;  %v1588_v48 = vld [vmem:[#allocation5 + $0x1e0] ss:$8 sps:$4 sm:$0xff]  }
  0x6a   :  { %723 = vmatpush1.bf16.msra.mxu1 %v1615_v26  ;;  %v1646_v47 = vld [vmem:[#allocation5 + $0x84] ss:$8 sps:$4 sm:$0xff]   ;;  %v1589_v49 = vld [vmem:[#allocation5 + $0x1f4] ss:$8 sps:$4 sm:$0xff]   ;;  %v1651_v50 = vld [vmem:[#allocation5 + $0x80] ss:$8 sps:$4 sm:$0xff]  }
  0x6b   :  { %724 = vmatprep.subr.bf16.mxu1 %v1616_v27  ;;  %v1591_v51 = vld [vmem:[#allocation5 + $0x1f0] ss:$8 sps:$4 sm:$0xff]   ;;  %v1652_v52 = vld [vmem:[#allocation5 + $0x94] ss:$8 sps:$4 sm:$0xff]   ;;  %v1594_v54 = vld [vmem:[#allocation5 + $0x204] ss:$8 sps:$4 sm:$0xff]  }
  0x6c   :  { %768 = vmatpush1.bf16.msra.mxu0 %v1558_v9  ;;  %v102_v53 = vld [vmem:[#allocation2 + $0x10] sm:$0xff]  ;;  %v1658_v56 = vld [vmem:[#allocation5 + $0xa4] ss:$8 sps:$4 sm:$0xff]   ;;  %v105_v58 = vld [vmem:[#allocation2 + $0x28] sm:$0xff]  ;;  %vm1874_vm1 = vmmov 0   ;;  %s1875_s11 = smov [#allocation11]  }
  0x6d   :  { %769 = vmatprep.subr.bf16.mxu0 %v1559_v10  ;;  %v1657_v55 = vld [vmem:[#allocation5 + $0x90] ss:$8 sps:$4 sm:$0xff]   ;;  %v109_v57 = vpack.c.bf16 %v102_v53, %v102_v53  ;;  %v1592_v59 = vld [vmem:[#allocation5 + $0x200] ss:$8 sps:$4 sm:$0xff]   ;;  %v112_v60 = vpack.c.bf16 %v105_v58, %v105_v58  ;;  %v1597_v61 = vld [vmem:[#allocation5 + $0x214] ss:$8 sps:$4 sm:$0xff]  }
  0x6e   :  { %725 = vmatpush1.bf16.msra.mxu1 %v1621_v30  ;;  %v1663_v62 = vld [vmem:[#allocation5 + $0xa0] ss:$8 sps:$4 sm:$0xff]   ;;  %v1664_v63 = vld [vmem:[#allocation5 + $0xb4] ss:$8 sps:$4 sm:$0xff]   ;;  %v1595_v1 = vld [vmem:[#allocation5 + $0x210] ss:$8 sps:$4 sm:$0xff]  }
  0x6f   :  { %726 = vmatprep.subr.bf16.mxu1 %v1622_v31  ;;  %v101_v0 = vld [vmem:[#allocation2 + $0x8] sm:$0xff]  ;;  %v1602_v3 = vld [vmem:[#allocation5 + $0x224] ss:$8 sps:$4 sm:$0xff]   ;;  %v1600_v6 = vld [vmem:[#allocation5 + $0x220] ss:$8 sps:$4 sm:$0xff]   ;;  %s1294_s12 = sshll.u32 %s1875_s11, 4  ;;  %s1295_s12 = int_to_ptr.vmem [resolvable:$true] %s1294_s12 }
  0x70   :  { %770 = vmatpush1.bf16.msra.mxu0 %v1561_v11  ;;  %v108_v2 = vpack.c.bf16 %v101_v0, %v101_v0  ;;  %v1669_v4 = vld [vmem:[#allocation5 + $0xb0] ss:$8 sps:$4 sm:$0xff]   ;;  %v1670_v5 = vld [vmem:[#allocation5 + $0xc4] ss:$8 sps:$4 sm:$0xff]   ;;  %v1608_v7 = vld [vmem:[#allocation5 + $0x234] ss:$8 sps:$4 sm:$0xff]   ;;  %p1838_p13 = scmp.lt.s32.totalorder %s1295_s12, %s1295_s12 }
  0x71   :  { %771 = vmatprep.subr.bf16.mxu0 %v1562_v12  ;;  %v1675_v8 = vld [vmem:[#allocation5 + $0xc0] ss:$8 sps:$4 sm:$0xff]   ;;  %v1676_v9 = vld [vmem:[#allocation5 + $0xd4] ss:$8 sps:$4 sm:$0xff]   ;;  %v1606_v10 = vld [vmem:[#allocation5 + $0x230] ss:$8 sps:$4 sm:$0xff]  }
  0x72   :  { %727 = vmatpush1.bf16.msra.mxu1 %v1627_v34  ;;  %750 = vmatprep.mubr.bf16.mxu1 %v108_v2  ;;  %v1614_v11 = vld [vmem:[#allocation5 + $0x244] ss:$8 sps:$4 sm:$0xff]   ;;  %v1612_v12 = vld [vmem:[#allocation5 + $0x240] ss:$8 sps:$4 sm:$0xff]   ;;  %v1681_v13 = vld [vmem:[#allocation5 + $0xd0] ss:$8 sps:$4 sm:$0xff]  }
  0x73   :  { %728 = vmatprep.subr.bf16.mxu1 %v1628_v35  ;;  %v1682_v14 = vld [vmem:[#allocation5 + $0xe4] ss:$8 sps:$4 sm:$0xff]   ;;  %v1688_v17 = vld [vmem:[#allocation5 + $0xf4] ss:$8 sps:$4 sm:$0xff]   ;;  %v1690_v20 = vld [vmem:[#allocation5 + $0xf0] ss:$8 sps:$4 sm:$0xff]  }
  0x74   :  { %772 = vmatpush1.bf16.msra.mxu0 %v1564_v15  ;;  %v1620_v15 = vld [vmem:[#allocation5 + $0x254] ss:$8 sps:$4 sm:$0xff]   ;;  %v100_v21 = vld [vmem:[#allocation2] sm:$0xff]  ;;  %v1695_v31 = vld [vmem:[#allocation7 + $0x50] sm:$0xff]  }
  0x75   :  { %773 = vmatprep.subr.bf16.mxu0 %v1565_v16  ;;  %v1687_v16 = vld [vmem:[#allocation5 + $0xe0] ss:$8 sps:$4 sm:$0xff]   ;;  %v1691_v22 = vld [vmem:[#allocation7 + $0x40] sm:$0xff]   ;;  %v107_v26 = vpack.c.bf16 %v100_v21, %v100_v21  ;;  %v1693_v27 = vld [vmem:[#allocation7 + $0x48] sm:$0xff]  }
  0x76   :  { %729 = vmatpush1.bf16.msra.mxu1 %v1633_v38  ;;  %v1624_v23 = vld [vmem:[#allocation5 + $0x260] ss:$8 sps:$4 sm:$0xff]   ;;  %v1694_v30 = vld [vmem:[#allocation7 + $0x8] sm:$0xff]   ;;  %v1686_v53 = vld [vmem:[#allocation5 + $0x304] ss:$8 sps:$4 sm:$0xff]  }
  0x77   :  { %730 = vmatprep.subr.bf16.mxu1 %v1634_v39  ;;  %v1696_v34 = vld [vmem:[#allocation7 + $0x10] sm:$0xff]   ;;  %v1697_v35 = vld [vmem:[#allocation7 + $0x58] sm:$0xff]   ;;  %v1699_v39 = vld [vmem:[#allocation7 + $0x60] sm:$0xff]  }
  0x78   :  { %774 = vmatpush1.bf16.msra.mxu0 %v1567_v18  ;;  %v1618_v18 = vld [vmem:[#allocation5 + $0x250] ss:$8 sps:$4 sm:$0xff]   ;;  %v1698_v38 = vld [vmem:[#allocation7 + $0x18] sm:$0xff]  }
  0x79   :  { %775 = vmatprep.subr.bf16.mxu0 %v1568_v19  ;;  %v1626_v19 = vld [vmem:[#allocation5 + $0x264] ss:$8 sps:$4 sm:$0xff]  }
  0x7a   :  { %731 = vmatpush1.bf16.msra.mxu1 %v1639_v42  ;;  %v1700_v42 = vld [vmem:[#allocation7 + $0x20] sm:$0xff]   ;;  %v1706_v0 = vld [vmem:[#allocation7 + $0x38] sm:$0xff]  }
  0x7b   :  { %732 = vmatprep.subr.bf16.mxu1 %v1640_v43  ;;  %v1654_v43 = vld [vmem:[#allocation5 + $0x2b0] ss:$8 sps:$4 sm:$0xff]  }
  0x7c   :  { %776 = vmatpush1.bf16.msra.mxu0 %v1570_v24  ;;  %v1632_v24 = vld [vmem:[#allocation5 + $0x274] ss:$8 sps:$4 sm:$0xff]  }
  0x7d   :  { %777 = vmatprep.subr.bf16.mxu0 %v1571_v25  ;;  %v1692_v25 = vld [vmem:[#allocation7] sm:$0xff]  }
  0x7e   :  { %733 = vmatpush1.bf16.msra.mxu1 %v1645_v46  ;;  %v1668_v46 = vld [vmem:[#allocation5 + $0x2d4] ss:$8 sps:$4 sm:$0xff]  }
  0x7f   :  { %734 = vmatprep.subr.bf16.mxu1 %v1646_v47  ;;  %v1666_v47 = vld [vmem:[#allocation5 + $0x2d0] ss:$8 sps:$4 sm:$0xff]  }
  0x80   :  { %778 = vmatpush1.bf16.msra.mxu0 %v1573_v28  ;;  %v1630_v28 = vld [vmem:[#allocation5 + $0x270] ss:$8 sps:$4 sm:$0xff]  }
  0x81   :  { %779 = vmatprep.subr.bf16.mxu0 %v1574_v29  ;;  %v1638_v29 = vld [vmem:[#allocation5 + $0x284] ss:$8 sps:$4 sm:$0xff]  }
  0x82   :  { %735 = vmatpush1.bf16.msra.mxu1 %v1651_v50  ;;  %v1680_v50 = vld [vmem:[#allocation5 + $0x2f4] ss:$8 sps:$4 sm:$0xff]  }
  0x83   :  { %736 = vmatprep.subr.bf16.mxu1 %v1652_v52  ;;  %v104_v52 = vld [vmem:[#allocation2 + $0x20] sm:$0xff] }
  0x84   :  { %780 = vmatpush1.bf16.msra.mxu0 %v1576_v32  ;;  %v1636_v32 = vld [vmem:[#allocation5 + $0x280] ss:$8 sps:$4 sm:$0xff]  }
  0x85   :  { %781 = vmatprep.subr.bf16.mxu0 %v1577_v33  ;;  %v1644_v33 = vld [vmem:[#allocation5 + $0x294] ss:$8 sps:$4 sm:$0xff]  }
  0x86   :  { %737 = vmatpush1.bf16.msra.mxu1 %v1657_v55  ;;  %v1684_v55 = vld [vmem:[#allocation5 + $0x300] ss:$8 sps:$4 sm:$0xff]  }
  0x87   :  { %738 = vmatprep.subr.bf16.mxu1 %v1658_v56  ;;  %v1872_v56 = vmov 0  }
  0x88   :  { %782 = vmatpush1.bf16.msra.mxu0 %v1579_v36  ;;  %v1642_v36 = vld [vmem:[#allocation5 + $0x290] ss:$8 sps:$4 sm:$0xff]  }
  0x89   :  { %783 = vmatprep.subr.bf16.mxu0 %v1580_v37  ;;  %v1650_v37 = vld [vmem:[#allocation5 + $0x2a4] ss:$8 sps:$4 sm:$0xff]  }
  0x8a   :  { %739 = vmatpush1.bf16.msra.mxu1 %v1663_v62  ;;  %v1704_v62 = vld [vmem:[#allocation7 + $0x30] sm:$0xff]  }
  0x8b   :  { %740 = vmatprep.subr.bf16.mxu1 %v1664_v63  ;;  %v1705_v63 = vld [vmem:[#allocation7 + $0x78] sm:$0xff]  }
  0x8c   :  { %784 = vmatpush1.bf16.msra.mxu0 %v1582_v40  ;;  %v1648_v40 = vld [vmem:[#allocation5 + $0x2a0] ss:$8 sps:$4 sm:$0xff]  }
  0x8d   :  { %785 = vmatprep.subr.bf16.mxu0 %v1583_v41  ;;  %v1656_v41 = vld [vmem:[#allocation5 + $0x2b4] ss:$8 sps:$4 sm:$0xff]  }
  0x8e   :  { %741 = vmatpush1.bf16.msra.mxu1 %v1669_v4 }
  0x8f   :  { %742 = vmatprep.subr.bf16.mxu1 %v1670_v5 }
  0x90   :  { %786 = vmatpush1.bf16.msra.mxu0 %v1585_v44  ;;  %v1662_v44 = vld [vmem:[#allocation5 + $0x2c4] ss:$8 sps:$4 sm:$0xff]  }
  0x91   :  { %787 = vmatprep.subr.bf16.mxu0 %v1586_v45  ;;  %v1660_v45 = vld [vmem:[#allocation5 + $0x2c0] ss:$8 sps:$4 sm:$0xff]  }
  0x92   :  { %743 = vmatpush1.bf16.msra.mxu1 %v1675_v8 }
  0x93   :  { %744 = vmatprep.subr.bf16.mxu1 %v1676_v9  ;;  %v212_v9 = vld [vmem:[%s2039_s2] sm:$0x3] }
  0x94   :  { %788 = vmatpush1.bf16.msra.mxu0 %v1588_v48  ;;  %v1674_v48 = vld [vmem:[#allocation5 + $0x2e4] ss:$8 sps:$4 sm:$0xff]  }
  0x95   :  { %789 = vmatprep.subr.bf16.mxu0 %v1589_v49  ;;  %v1672_v49 = vld [vmem:[#allocation5 + $0x2e0] ss:$8 sps:$4 sm:$0xff]  }
  0x96   :  { %745 = vmatpush1.bf16.msra.mxu1 %v1681_v13 }
  0x97   :  { %746 = vmatprep.subr.bf16.mxu1 %v1682_v14 }
  0x98   :  { %790 = vmatpush1.bf16.msra.mxu0 %v1591_v51  ;;  %v1678_v51 = vld [vmem:[#allocation5 + $0x2f0] ss:$8 sps:$4 sm:$0xff]  }
  0x99   :  { %800 = vmatprep.subr.bf16.mxu0 %v1594_v54  ;;  %v111_v54 = vpack.c.bf16 %v104_v52, %v104_v52 }
  0x9a   :  { %747 = vmatpush1.bf16.msra.mxu1 %v1687_v16 }
  0x9b   :  { %792 = vmatmul.mubr.bf16.vlgmr.msra.gmra.mrb[0].mxu0 %v109_v57  ;;  %748 = vmatprep.subr.bf16.mxu1 %v1688_v17  ;;  %v106_v57 = vld [vmem:[#allocation2 + $0x30] sm:$0xff] }
  0x9c   :  { %801 = vmatpush1.bf16.msra.mxu0 %v1592_v59  ;;  %832 = vmatprep.mubr.bf16.mxu0 %v112_v60  ;;  %v113_v58 = vpack.c.bf16 %v106_v57, %v106_v57  ;;  %v1701_v59 = vld [vmem:[#allocation7 + $0x68] sm:$0xff]  }
  0x9d   :  { %802 = vmatprep.subr.bf16.mxu0 %v1597_v61  ;;  %v1702_v60 = vld [vmem:[#allocation7 + $0x28] sm:$0xff]   ;;  %v1703_v61 = vld [vmem:[#allocation7 + $0x70] sm:$0xff]  }
  0x9e   :  { %749 = vmatpush1.bf16.msra.mxu1 %v1690_v20 }
  0x9f   :  { %1439 = vmatprep.subr.bf16.mxu1 %v1691_v22 }
  0xa0   :  { %803 = vmatpush1.bf16.msra.mxu0 %v1595_v1  ;;  %v1873_v1 = vmov 0.0  }
  0xa1   :  { %804 = vmatprep.subr.bf16.mxu0 %v1602_v3  ;;  %751 = vmatmul.mubr.bf16.vlgmr.msra.gmra.mrb[0].mxu1 %v107_v26  ;;  %v1708_v26 = vld [vmem:[#allocation8 + $0x8] sm:$0xff]  }
  0xa2   :  { %1440 = vmatpush3.bf16.msra.mxu1 %v1692_v25 }
  0xa3   :  { %1441 = vmatprep.subr.bf16.mxu1 %v1693_v27  ;;  %v1709_v27 = vld [vmem:[#allocation8 + $0x10] sm:$0xff]  }
  0xa4   :  { %805 = vmatpush1.bf16.msra.mxu0 %v1600_v6  ;;  %v214_v6 = vlaneseq }
  0xa5   :  { %806 = vmatprep.subr.bf16.mxu0 %v1608_v7 }
  0xa6   :  { %1442 = vmatpush3.bf16.msra.mxu1 %v1694_v30  ;;  %v215_v7 = vshrl.u32 %v214_v6, 7  ;;  %v1712_v30 = vld [vmem:[#allocation8 + $0x28] sm:$0xff]  }
  0xa7   :  { %1443 = vmatprep.subr.bf16.mxu1 %v1695_v31  ;;  %v1713_v31 = vld [vmem:[#allocation8 + $0x30] sm:$0xff]  }
  0xa8   :  { %807 = vmatpush1.bf16.msra.mxu0 %v1606_v10  ;;  %v216_v8 = vsub.s32 0, %v215_v7  ;;  %v220_v10 = vsub.s32 1, %v215_v7 }
  0xa9   :  { %808 = vmatprep.subr.bf16.mxu0 %v1614_v11 }
  0xaa   :  { %1444 = vmatpush3.bf16.msra.mxu1 %v1696_v34  ;;  %v217_v11 = vrot.slane %v212_v9, %v216_v8  ;;  %v1404_v34 = vld [vmem:[%s2041_s4] ss:$0 sm:$0xff] }
  0xab   :  { %1445 = vmatprep.subr.bf16.mxu1 %v1697_v35 }
  0xac   :  { %809 = vmatpush1.bf16.msra.mxu0 %v1612_v12  ;;  %v221_v12 = vrot.slane %v212_v9, %v220_v10 }
  0xad   :  { %810 = vmatprep.subr.bf16.mxu0 %v1620_v15 }
  0xae   :  { %1446 = vmatpush3.bf16.msra.mxu1 %v1698_v38 }
  0xaf   :  { %1447 = vmatprep.subr.bf16.mxu1 %v1699_v39 }
  0xb0   :  { %811 = vmatpush1.bf16.msra.mxu0 %v1618_v18 }
  0xb1   :  { %812 = vmatprep.subr.bf16.mxu0 %v1626_v19 }
  0xb2   :  { %1448 = vmatpush3.bf16.msra.mxu1 %v1700_v42 }
  0xb3   :  { %1449 = vmatprep.subr.bf16.mxu1 %v1701_v59 }
  0xb4   :  { %813 = vmatpush1.bf16.msra.mxu0 %v1624_v23 }
  0xb5   :  { %814 = vmatprep.subr.bf16.mxu0 %v1632_v24  ;;  %v1707_v24 = vld [vmem:[#allocation8] sm:$0xff]  }
  0xb6   :  { %1450 = vmatpush3.bf16.msra.mxu1 %v1702_v60 }
  0xb7   :  { %1451 = vmatprep.subr.bf16.mxu1 %v1703_v61 }
  0xb8   :  { %815 = vmatpush1.bf16.msra.mxu0 %v1630_v28  ;;  %v1710_v28 = vld [vmem:[#allocation8 + $0x18] sm:$0xff]  }
  0xb9   :  { %816 = vmatprep.subr.bf16.mxu0 %v1638_v29  ;;  %v1711_v29 = vld [vmem:[#allocation8 + $0x20] sm:$0xff]  }
  0xba   :  { %1452 = vmatpush3.bf16.msra.mxu1 %v1704_v62 }
  0xbb   :  { %1453 = vmatprep.subr.bf16.mxu1 %v1705_v63 }
  0xbc   :  { %817 = vmatpush1.bf16.msra.mxu0 %v1636_v32  ;;  %v1714_v32 = vld [vmem:[#allocation8 + $0x38] sm:$0xff]  }
  0xbd   :  { %818 = vmatprep.subr.bf16.mxu0 %v1644_v33 }
  0xbe   :  { %1454 = vmatpush3.bf16.msra.mxu1 %v1706_v0 }
  0xbf   :  { %1479 = vmatprep.subr.bf16.mxu1 %v1873_v1 }
  0xc0   :  { %819 = vmatpush1.bf16.msra.mxu0 %v1642_v36 }
  0xc1   :  { %820 = vmatprep.subr.bf16.mxu0 %v1650_v37 }
  0xc4   :  { %821 = vmatpush1.bf16.msra.mxu0 %v1648_v40 }
  0xc5   :  { %822 = vmatprep.subr.bf16.mxu0 %v1656_v41  ;;  %v1715_v41 = vld [vmem:[#allocation10] sm:$0xff]  }
  0xc8   :  { %823 = vmatpush1.bf16.msra.mxu0 %v1654_v43  ;;  %v1716_v43 = vld [vmem:[#allocation10 + $0x8] sm:$0xff]  }
  0xc9   :  { %824 = vmatprep.subr.bf16.mxu0 %v1662_v44  ;;  %v1717_v44 = vld [vmem:[#allocation10 + $0x10] sm:$0xff]  }
  0xcc   :  { %825 = vmatpush1.bf16.msra.mxu0 %v1660_v45  ;;  %v1718_v45 = vld [vmem:[#allocation10 + $0x18] sm:$0xff]  }
  0xcd   :  { %826 = vmatprep.subr.bf16.mxu0 %v1668_v46  ;;  %v1719_v46 = vld [vmem:[#allocation10 + $0x20] sm:$0xff]  }
  0xd0   :  { %827 = vmatpush1.bf16.msra.mxu0 %v1666_v47  ;;  %v1720_v47 = vld [vmem:[#allocation10 + $0x28] sm:$0xff]  }
  0xd1   :  { %828 = vmatprep.subr.bf16.mxu0 %v1674_v48  ;;  %v1721_v48 = vld [vmem:[#allocation10 + $0x30] sm:$0xff]  }
  0xd4   :  { %829 = vmatpush1.bf16.msra.mxu0 %v1672_v49  ;;  %v1722_v49 = vld [vmem:[#allocation10 + $0x38] sm:$0xff]  }
  0xd5   :  { %830 = vmatprep.subr.bf16.mxu0 %v1680_v50  ;;  %v1421_v50 = vld [vmem:[%s2043_s6] ss:$0 sm:$0xff]  ;;  %s1833_s6 = scalar_lea.vmem %s1295_s12, 128 }
  0xd6   :  { %p1834_p12 = scmp.ne.s32.totalorder %s1295_s12, %s1833_s6  ;;  %p1839_p0 = scmp.lt.s32.totalorder %s1833_s6, %s1833_s6 }
  0xd8   :  { %831 = vmatpush1.bf16.msra.mxu0 %v1678_v51  ;;  %p1840_p1 = por %p1839_p0, %p1838_p13 }
  0xd9   :  { %841 = vmatprep.subr.bf16.mxu0 %v1686_v53 }
  0xda   :  { %p1841_p2 = pnand %p1840_p1, %p1834_p12 }
  0xdb   :  { %833 = vmatmul.mubr.bf16.vlgmr.msra.gmra.mrb[0].mxu0 %v111_v54 }
  0xdc   :  { %842 = vmatpush1.bf16.msra.mxu0 %v1684_v55  ;;  %873 = vmatprep.mubr.bf16.mxu0 %v1872_v56 }
  0xe7   :  { %1403 = vmatmul.mubr.msk.bf16.vlgmr.msra.gmra.mrb[0].mxu0 %vm714_vm0, %v113_v58  ;;  %v1430_v58 = vld [vmem:[%s2045_s8] ss:$0 sm:$0xff] }
 0x174   :  { %v752_v2 = vpop.f32.mrb[0].mxu1 }
 0x175   :  { %v754_v3 = vpop.f32.mrb[1].mxu1  ;;  %v753_v13 = vadd.f32 %v752_v2, %v217_v11 }
 0x176   :  { %v756_v4 = vpop.f32.mrb[2].mxu1  ;;  %v755_v14 = vadd.f32 %v754_v3, %v221_v12 }
 0x177   :  { %v757_v5 = vpop.f32.mrb[3].mxu1 }
 0x1ba   :  { %v875_v15 = vpop.f32.mrb[0].mxu0 }
 0x1bb   :  { %v1520_v16 = vadd.f32 %v875_v15, %v753_v13  ;;  %v877_v17 = vpop.f32.mrb[1].mxu0 }
 0x1bc   :  { %v1522_v18 = vadd.f32 %v877_v17, %v755_v14  ;;  %v879_v19 = vpop.f32.mrb[2].mxu0 }
 0x1bd   :  { %v882_v20 = vmax.f32 %v1520_v16, 0.0  ;;  %v880_v21 = vpop.f32.mrb[3].mxu0 }
 0x1be   :  { %v883_v22 = vmax.f32 %v1522_v18, 0.0 }
 0x1bf   :  { %v884_v25 = vpack.c.bf16 %v882_v20, %v882_v20 }
 0x1c0   :  { %v885_v23 = vpack.c.bf16 %v883_v22, %v883_v22 }
 0x1c2   :  { %1053 = vmatprep.mubr.bf16.mxu1 %v885_v23 }
 0x1c3   :  { %1054 = vmatmul.mubr.bf16.vlgmr.msra.gmra.mrb[4].mxu1 %v884_v25 }
 0x1c4   :  { %1480 = vmatpush3.bf16.msra.mxu1 %v1707_v24  ;;  %1495 = vmatprep.mubr.msk.bf16.mxu1 %vm1874_vm1, %v1873_v1 }
 0x1c5   :  { %1481 = vmatprep.subr.bf16.mxu1 %v1873_v1 }
 0x1c8   :  { %1482 = vmatpush3.bf16.msra.mxu1 %v1708_v26 }
 0x1c9   :  { %1483 = vmatprep.subr.bf16.mxu1 %v1873_v1 }
 0x1cc   :  { %1484 = vmatpush3.bf16.msra.mxu1 %v1709_v27 }
 0x1cd   :  { %1485 = vmatprep.subr.bf16.mxu1 %v1873_v1 }
 0x1d0   :  { %1486 = vmatpush3.bf16.msra.mxu1 %v1710_v28 }
 0x1d1   :  { %1487 = vmatprep.subr.bf16.mxu1 %v1873_v1 }
 0x1d4   :  { %1488 = vmatpush3.bf16.msra.mxu1 %v1711_v29 }
 0x1d5   :  { %1489 = vmatprep.subr.bf16.mxu1 %v1873_v1 }
 0x1d8   :  { %1490 = vmatpush3.bf16.msra.mxu1 %v1712_v30 }
 0x1d9   :  { %1491 = vmatprep.subr.bf16.mxu1 %v1873_v1 }
 0x1dc   :  { %1492 = vmatpush3.bf16.msra.mxu1 %v1713_v31 }
 0x1dd   :  { %1493 = vmatprep.subr.bf16.mxu1 %v1873_v1 }
 0x1e0   :  { %1494 = vmatpush3.bf16.msra.mxu1 %v1714_v32 }
 0x1e1   :  { %1499 = vmatprep.subr.bf16.mxu1 %v1873_v1 }
 0x296   :  { %v1455_v33 = vpop.f32.mrb[4].mxu1 }
 0x297   :  { %v1456_v35 = vpop.f32.mrb[5].mxu1 }
 0x298   :  { %v1457_v36 = vadd.f32 %v1456_v35, %v1455_v33  ;;  %v1458_v37 = vpop.f32.mrb[6].mxu1 }
 0x299   :  { %v1459_v38 = vpop.f32.mrb[7].mxu1 }
 0x29a   :  { %v1056_v39 = vadd.f32 %v1457_v36, %v1404_v34 }
 0x29c   :  { %v1061_v40 = vmax.f32 %v1056_v39, 0.0 }
 0x29e   :  { %v1062_v42 = vpack.c.bf16 %v1061_v40, %v1061_v40 }
 0x2a0   :  { %1496 = vmatmul.mubr.bf16.vlgmr.msra.gmra.mrb[8].mxu1 %v1062_v42 }
 0x2a1   :  { %1500 = vmatpush3.bf16.msra.mxu1 %v1715_v41  ;;  %1515 = vmatprep.mubr.msk.bf16.mxu1 %vm1874_vm1, %v1873_v1 }
 0x2a2   :  { %1501 = vmatprep.subr.bf16.mxu1 %v1873_v1 }
 0x2a5   :  { %1502 = vmatpush3.bf16.msra.mxu1 %v1716_v43 }
 0x2a6   :  { %1503 = vmatprep.subr.bf16.mxu1 %v1873_v1 }
 0x2a9   :  { %1504 = vmatpush3.bf16.msra.mxu1 %v1717_v44 }
 0x2aa   :  { %1505 = vmatprep.subr.bf16.mxu1 %v1873_v1 }
 0x2ad   :  { %1506 = vmatpush3.bf16.msra.mxu1 %v1718_v45 }
 0x2ae   :  { %1507 = vmatprep.subr.bf16.mxu1 %v1873_v1 }
 0x2b1   :  { %1508 = vmatpush3.bf16.msra.mxu1 %v1719_v46 }
 0x2b2   :  { %1509 = vmatprep.subr.bf16.mxu1 %v1873_v1 }
 0x2b5   :  { %1510 = vmatpush3.bf16.msra.mxu1 %v1720_v47 }
 0x2b6   :  { %1511 = vmatprep.subr.bf16.mxu1 %v1873_v1 }
 0x2b9   :  { %1512 = vmatpush3.bf16.msra.mxu1 %v1721_v48 }
 0x2ba   :  { %1513 = vmatprep.subr.bf16.mxu1 %v1873_v1 }
 0x2bd   :  { %1514 = vmatpush3.bf16.msra.mxu1 %v1722_v49 }
 0x373   :  { %v1168_v51 = vpop.f32.mrb[8].mxu1 }
 0x374   :  { %v1169_v52 = vadd.f32 %v1421_v50, %v1168_v51  ;;  %v1497_v53 = vpop.f32.mrb[9].mxu1 }
 0x375   :  { %v1171_v54 = vpop.f32.mrb[10].mxu1 }
 0x376   :  { %v1174_v55 = vmax.f32 %v1169_v52, 0.0  ;;  %v1498_v56 = vpop.f32.mrb[11].mxu1 }
 0x378   :  { %v1175_v57 = vpack.c.bf16 %v1174_v55, %v1174_v55 }
 0x37a   :  { %1516 = vmatmul.mubr.bf16.vlgmr.msra.gmra.mrb[12].mxu1 %v1175_v57 }
 0x44d   :  { %v1281_v59 = vpop.f32.mrb[12].mxu1 }
 0x44e   :  { %v1282_v60 = vadd.f32 %v1430_v58, %v1281_v59  ;;  %v1517_v61 = vpop.f32.mrb[13].mxu1 }
 0x44f   :  { %v1284_v62 = vpop.f32.mrb[14].mxu1 }
 0x450   :  { %1287 = vst [vmem:[#allocation11] sm:$0xff] %v1282_v60  ;;  %v1518_v63 = vpop.f32.mrb[15].mxu1 }
 0x451   :  { %1844 = shalt.err (!%p1841_p2)
}
 0x452   :  { %s1845_s8 = scalar_lea.hbm %s2046_s9, 128 }
 0x453   :  { %p1846_p3 = scmp.ne.s32.totalorder %s2046_s9, %s1845_s8  ;;  %p1849_p4 = scmp.lt.u32.totalorder %s1845_s8, %s2046_s9 }
 0x455   :  { %p1851_p5 = pnand %p1849_p4, %p1846_p3 }
 0x457   :  { %1854 = shalt.err (!%p1851_p5)
}
 0x458   :  { %1297 = dma.vmem_to_hbm [thread:$0]  %s1295_s12, 128, %s2046_s9, [#allocation4]  }
 0x459   :  { %1861 = dma.done.wait [#allocation4], 128  }
 0x45a   :  { %1862 = vsyncadd [#allocation4], 4294967168 }
 0x45b   :  { %1301 = vsyncpa [#allocation3], 1 }
 0x45c   :  { %1302 = vsyncpa [#allocation6], 1 }
 0x45d   :  { %1303 = vsyncpa [#allocation9], 1 }
 0x45e   :  { %1304 = vsyncpa [#allocation4], 1 }

</bundles_post_ra>
